<compile_context>
chip_gen: v5e
topology: v5e:2x2
jax: 0.10.0
libtpu: 0.0.40
codegen_flags: <defaults>
</compile_context>

<pallas_src>
import functools
import math

import jax
import jax.numpy as jnp
from jax.experimental import pallas as pl
from jax.experimental.pallas import tpu as pltpu


# ---------------------------------------------------------------------------
# helpers
# ---------------------------------------------------------------------------

def _round_up(x, m):
    return ((x + m - 1) // m) * m


def _pick_div(dim, prefs):
    """Largest preferred tile that divides `dim` (dim is a multiple of 128)."""
    for t in prefs:
        if t <= dim and dim % t == 0:
            return t
    return dim


def _choose_tm(m):
    """M tile: multiple of 8, MXU-friendly, and (when possible) giving >= 2 blocks
    along the 'parallel' grid axis so v7x's two TensorCores both get work."""
    m8 = _round_up(max(m, 1), 8)
    tm = 8
    for t in (512, 256, 128, 64, 32, 16, 8):
        if t <= m8:
            tm = t
            break
    if -(-m8 // tm) < 2 and tm > 8:   # expose >= 2 parallel blocks (megacore)
        tm //= 2
    return tm


def _vmem_budget_bytes():
    """Generation-aware VMEM budget (v5e/v6e: 128 MiB physical, v7x: 64 MiB)."""
    try:
        cap = int(pltpu.get_tpu_info().vmem_capacity_bytes)
    except Exception:
        cap = 64 * 1024 * 1024  # conservative: safe on every generation
    return int(min(max(cap * 3 // 4, 32 * 1024 * 1024), 96 * 1024 * 1024))


def _pad2d(a, rows, cols):
    pr, pc = rows - a.shape[0], cols - a.shape[1]
    if pr == 0 and pc == 0:
        return a
    return jnp.pad(a, ((0, pr), (0, pc)))


def _pad1d(a, n):
    p = n - a.shape[0]
    return a if p == 0 else jnp.pad(a, (0, p))


# ---------------------------------------------------------------------------
# fused kernel: y = relu(x @ w1 + b1) @ w2 + b2, hidden never leaves VMEM
# ---------------------------------------------------------------------------

def _ffn_fused_kernel(x_ref, w1_ref, b1_ref, w2_ref, b2_ref, o_ref, h_acc,
                      *, compute_dtype):
    k = pl.program_id(1)

    @pl.when(k == 0)
    def _init():
        h_acc[...] = jnp.zeros_like(h_acc)

    # First GEMM: bf16 MXU path, f32 accumulator resident across the K1 axis.
    h_acc[...] += jnp.dot(x_ref[...].astype(compute_dtype), w1_ref[...],
                          preferred_element_type=jnp.float32)

    @pl.when(k == pl.num_programs(1) - 1)
    def _epilogue():
        # Bias + ReLU in f32.  Dropout(0.2) is an identity at inference.
        # TODO(synk): a training-mode kernel would fuse pltpu.prng_seed +
        # pltpu.stateful_bernoulli here instead of a separate HBM-bound pass.
        h = jnp.maximum(h_acc[...] + b1_ref[...].astype(jnp.float32), 0.0)
        # Second GEMM against the VMEM-resident w2 slab; h never touches HBM.
        y = jnp.dot(h.astype(compute_dtype), w2_ref[...],
                    preferred_element_type=jnp.float32)
        o_ref[...] = (y + b2_ref[...].astype(jnp.float32)).astype(o_ref.dtype)


def _ffn_fused_pallas(xp, w1p, b1p, w2p, b2p, *, tm, tk1, out_dtype,
                      compute_dtype, budget):
    m_p, k1_p = xp.shape
    h2_p = w1p.shape[1]
    n_p = w2p.shape[1]
    grid = (m_p // tm, k1_p // tk1)
    kernel = functools.partial(_ffn_fused_kernel, compute_dtype=compute_dtype)
    return pl.pallas_call(
        kernel,
        out_shape=jax.ShapeDtypeStruct((m_p, n_p), out_dtype),
        grid=grid,
        in_specs=[
            pl.BlockSpec((tm, tk1), lambda i, k: (i, k)),     # x tile
            pl.BlockSpec((tk1, h2_p), lambda i, k: (k, 0)),   # w1 K-slab
            pl.BlockSpec((1, h2_p), lambda i, k: (0, 0)),     # b1
            pl.BlockSpec((h2_p, n_p), lambda i, k: (0, 0)),   # w2 (VMEM-resident)
            pl.BlockSpec((1, n_p), lambda i, k: (0, 0)),      # b2
        ],
        out_specs=pl.BlockSpec((tm, n_p), lambda i, k: (i, 0)),
        scratch_shapes=[pltpu.VMEM((tm, h2_p), jnp.float32)],  # resident h accumulator
        compiler_params=pltpu.CompilerParams(
            dimension_semantics=("parallel", "arbitrary"),
            vmem_limit_bytes=budget,
        ),
    )(xp, w1p, b1p, w2p, b2p)


# ---------------------------------------------------------------------------
# fallback: tiled single Linear (used only when w2 cannot stay VMEM-resident)
# ---------------------------------------------------------------------------

def _linear_kernel(x_ref, w_ref, b_ref, o_ref, *scratch, apply_relu, compute_dtype):
    # f32 outputs accumulate directly into the resident output block (no scratch,
    # no epilogue copy); narrow output dtypes use an f32 VMEM scratch.
    acc_ref = scratch[0] if scratch else o_ref
    k = pl.program_id(2)

    @pl.when(k == 0)
    def _init():
        acc_ref[...] = jnp.zeros_like(acc_ref)

    acc_ref[...] += jnp.dot(x_ref[...].astype(compute_dtype), w_ref[...],
                            preferred_element_type=jnp.float32)

    @pl.when(k == pl.num_programs(2) - 1)
    def _epilogue():
        acc = acc_ref[...] + b_ref[...].astype(acc_ref.dtype)
        if apply_relu:
            acc = jnp.maximum(acc, 0.0)
        o_ref[...] = acc.astype(o_ref.dtype)


def _linear_pallas(x, w, b2d, *, apply_relu, out_dtype, compute_dtype, tm, budget):
    m, kdim = x.shape
    n = w.shape[1]
    x_bytes = x.dtype.itemsize
    w_bytes = w.dtype.itemsize
    out_bytes = jnp.dtype(out_dtype).itemsize
    use_scratch = jnp.dtype(out_dtype) != jnp.dtype(jnp.float32)

    tk = _pick_div(kdim, (512, 256, 128))
    tn = _pick_div(n, (512, 256, 128))

    def vmem_est(tm_, tn_, tk_):
        return (2 * tm_ * tk_ * x_bytes + 2 * tk_ * tn_ * w_bytes
                + 2 * tm_ * tn_ * out_bytes
                + (tm_ * tn_ * 4 if use_scratch else 0) + 2 * tn_ * 4)

    while vmem_est(tm, tn, tk) > 0.9 * budget:
        if tk > 128:
            tk //= 2
        elif tn > 128:
            tn //= 2
        elif tm > 8:
            tm //= 2
        else:
            break

    grid = (m // tm, n // tn, kdim // tk)
    kernel = functools.partial(_linear_kernel, apply_relu=apply_relu,
                               compute_dtype=compute_dtype)
    scratch = [pltpu.VMEM((tm, tn), jnp.float32)] if use_scratch else []
    return pl.pallas_call(
        kernel,
        out_shape=jax.ShapeDtypeStruct((m, n), out_dtype),
        grid=grid,
        in_specs=[
            pl.BlockSpec((tm, tk), lambda i, j, k: (i, k)),
            pl.BlockSpec((tk, tn), lambda i, j, k: (k, j)),
            pl.BlockSpec((1, tn), lambda i, j, k: (0, j)),
        ],
        out_specs=pl.BlockSpec((tm, tn), lambda i, j, k: (i, j)),
        scratch_shapes=scratch,
        compiler_params=pltpu.CompilerParams(
            dimension_semantics=("parallel", "parallel", "arbitrary"),
            vmem_limit_bytes=budget,
        ),
    )(x, w, b2d)


# ---------------------------------------------------------------------------
# top-level FFN
# ---------------------------------------------------------------------------

def feedforward_pallas(x2d, w1, b1, w2, b2, *, compute_dtype=jnp.bfloat16):
    m, k1 = x2d.shape
    h2 = w1.shape[1]
    n = w2.shape[1]
    assert w1.shape[0] == k1 and w2.shape[0] == h2
    assert b1.shape == (h2,) and b2.shape == (n,)

    out_dtype = x2d.dtype
    budget = _vmem_budget_bytes()
    cd = jnp.dtype(compute_dtype)

    tm = _choose_tm(m)
    m_p = _round_up(m, tm)
    k1_p = _round_up(k1, 128)
    h2_p = _round_up(h2, 128)
    n_p = _round_up(n, 128)
    tk1 = _pick_div(k1_p, (1024, 512, 256, 128))

    # Zero-padding is exact: padded K1 columns contribute 0 to h, padded hidden
    # columns are relu(0 + 0) = 0 and multiply zero rows of w2, padded M/N
    # rows/columns are sliced off below.
    xp = _pad2d(x2d, m_p, k1_p)
    w1p = _pad2d(w1, k1_p, h2_p).astype(cd)
    w2p = _pad2d(w2, h2_p, n_p).astype(cd)
    b1p = _pad1d(b1, h2_p).astype(jnp.float32).reshape(1, h2_p)
    b2p = _pad1d(b2, n_p).astype(jnp.float32).reshape(1, n_p)

    x_bytes = xp.dtype.itemsize
    out_bytes = jnp.dtype(out_dtype).itemsize
    fused_bytes = (2 * tm * tk1 * x_bytes           # x tiles (double-buffered)
                   + 2 * tk1 * h2_p * cd.itemsize   # w1 K-slabs
                   + 2 * h2_p * n_p * cd.itemsize   # w2 slab
                   + 2 * tm * n_p * out_bytes       # out tiles
                   + tm * h2_p * 4                  # h accumulator
                   + 2 * (h2_p + n_p) * 4)          # biases

    if fused_bytes <= 0.9 * budget:
        y = _ffn_fused_pallas(xp, w1p, b1p, w2p, b2p, tm=tm, tk1=tk1,
                              out_dtype=out_dtype, compute_dtype=cd, budget=budget)
    else:
        # Very large hidden dims: two tiled GEMMs; the hidden activation
        # round-trips HBM, but in compute_dtype (half the bytes of f32).
        h = _linear_pallas(xp, w1p, b1p, apply_relu=True, out_dtype=cd,
                           compute_dtype=cd, tm=tm, budget=budget)
        y = _linear_pallas(h, w2p, b2p, apply_relu=False, out_dtype=out_dtype,
                           compute_dtype=cd, tm=tm, budget=budget)

    if m_p != m or n_p != n:
        y = y[:m, :n]
    return y


class FeedForwardPallas:
    """Pallas equivalent of the PyTorch FeedForward module (inference mode)."""

    def __init__(self, in_features, hidden, key, dtype=jnp.float32,
                 compute_dtype=jnp.bfloat16):
        k1, k2, k3, k4 = jax.random.split(key, 4)
        # Match nn.Linear default init: U(-1/sqrt(fan_in), 1/sqrt(fan_in)).
        bound1 = 1.0 / math.sqrt(in_features)
        self.w1 = jax.random.uniform(k1, (in_features, hidden * 2), dtype,
                                     minval=-bound1, maxval=bound1)
        self.b1 = jax.random.uniform(k2, (hidden * 2,), dtype,
                                     minval=-bound1, maxval=bound1)
        bound2 = 1.0 / math.sqrt(hidden * 2)
        self.w2 = jax.random.uniform(k3, (hidden * 2, hidden), dtype,
                                     minval=-bound2, maxval=bound2)
        self.b2 = jax.random.uniform(k4, (hidden,), dtype,
                                     minval=-bound2, maxval=bound2)
        self.compute_dtype = compute_dtype

    def __call__(self, x):
        lead = x.shape[:-1]
        x2d = x.reshape(-1, x.shape[-1])
        y2d = feedforward_pallas(x2d, self.w1, self.b1, self.w2, self.b2,
                                 compute_dtype=self.compute_dtype)
        return y2d.reshape(*lead, y2d.shape[-1])


if __name__ == "__main__":
    # Small-but-MXU-friendly shapes: batch=2, seq=64, in_features=512, hidden=128.
    batch, seq, in_features, hidden = 2, 64, 512, 128

    key = jax.random.PRNGKey(0)
    kx, kp = jax.random.split(key)
    x = jax.random.normal(kx, (batch, seq, in_features), dtype=jnp.float32)

    ffn = FeedForwardPallas(in_features, hidden, kp, dtype=jnp.float32)

    y = ffn(x)
    jax.block_until_ready(y)

    # Pure-JAX f32 reference (dropout is identity in eval mode).
    x2d = x.reshape(-1, in_features)
    h_ref = jnp.maximum(x2d @ ffn.w1 + ffn.b1, 0.0)
    y_ref = (h_ref @ ffn.w2 + ffn.b2).reshape(batch, seq, hidden)

    assert y.shape == (batch, seq, hidden) and y.dtype == jnp.float32
    assert bool(jnp.allclose(y, y_ref, rtol=2e-2, atol=2e-2)), (
        float(jnp.max(jnp.abs(y - y_ref)))
    )

    print("KERNEL_OK")
</pallas_src>

<mosaic_0001>
module attributes {stable_mosaic.version = 11 : i64} {
  func.func @_ffn_fused_kernel(%arg0: i32, %arg1: i32, %arg2: memref<64x512xf32, #tpu.memory_space<vmem>>, %arg3: memref<512x256xbf16, #tpu.memory_space<vmem>>, %arg4: memref<1x256xf32, #tpu.memory_space<vmem>>, %arg5: memref<256x128xbf16, #tpu.memory_space<vmem>>, %arg6: memref<1x128xf32, #tpu.memory_space<vmem>>, %arg7: memref<64x128xf32, #tpu.memory_space<vmem>>, %arg8: memref<64x256xf32, #tpu.memory_space<vmem>>) attributes {dimension_semantics = [#tpu.dimension_semantics<parallel>, #tpu.dimension_semantics<arbitrary>], iteration_bounds = array<i64: 2, 1>, scalar_prefetch = 0 : i64, scratch_operands = 1 : i64, tpu.core_type = #tpu.core_type<tc>, window_params = [{transform_indices = @transform_0, window_bounds = array<i64: 64, 512>}, {transform_indices = @transform_1, window_bounds = array<i64: 512, 256>}, {pipeline_mode = #tpu.pipeline_mode<synchronous>, transform_indices = @transform_2, window_bounds = array<i64: 1, 256>}, {pipeline_mode = #tpu.pipeline_mode<synchronous>, transform_indices = @transform_3, window_bounds = array<i64: 256, 128>}, {pipeline_mode = #tpu.pipeline_mode<synchronous>, transform_indices = @transform_4, window_bounds = array<i64: 1, 128>}, {transform_indices = @transform_5, window_bounds = array<i64: 64, 128>}]} {
    %c0_i32 = arith.constant 0 : i32
    %0 = arith.cmpi eq, %arg1, %c0_i32 : i32
    %1 = arith.extui %0 : i1 to i32
    %c0_i32_0 = arith.constant 0 : i32
    %2 = arith.cmpi ne, %1, %c0_i32_0 : i32
    scf.if %2 {
      %cst_10 = arith.constant 0.000000e+00 : f32
      %13 = vector.broadcast %cst_10 : f32 to vector<64x256xf32>
      %c0_11 = arith.constant 0 : index
      %c0_12 = arith.constant 0 : index
      %14 = vector.load %arg8[%c0_11, %c0_12] : memref<64x256xf32, #tpu.memory_space<vmem>>, vector<64x256xf32>
      tpu.vector_store %arg8[%c0_11, %c0_12], %13 {strides = array<i32>} : memref<64x256xf32, #tpu.memory_space<vmem>>, vector<64x256xf32>,
    } else {
    }
    %c0 = arith.constant 0 : index
    %c0_1 = arith.constant 0 : index
    %3 = vector.load %arg8[%c0, %c0_1] : memref<64x256xf32, #tpu.memory_space<vmem>>, vector<64x256xf32>
    %c0_2 = arith.constant 0 : index
    %c0_3 = arith.constant 0 : index
    %4 = vector.load %arg2[%c0_2, %c0_3] : memref<64x512xf32, #tpu.memory_space<vmem>>, vector<64x512xf32>
    %5 = arith.truncf %4 : vector<64x512xf32> to vector<64x512xbf16>
    %c0_4 = arith.constant 0 : index
    %c0_5 = arith.constant 0 : index
    %6 = vector.load %arg3[%c0_4, %c0_5] : memref<512x256xbf16, #tpu.memory_space<vmem>>, vector<512x256xbf16>
    %cst = arith.constant dense<0.000000e+00> : vector<64x256xf32>
    %7 = tpu.matmul %5, %6, %cst {dimension_numbers = #tpu.dot_dimension_numbers<[1], [0], [0], [1], [0, 0, 1, 1], [], []>} : vector<64x512xbf16>, vector<512x256xbf16>, vector<64x256xf32> -> vector<64x256xf32>
    %8 = arith.addf %3, %7 : vector<64x256xf32>
    %c0_6 = arith.constant 0 : index
    %c0_7 = arith.constant 0 : index
    %9 = vector.load %arg8[%c0_6, %c0_7] : memref<64x256xf32, #tpu.memory_space<vmem>>, vector<64x256xf32>
    tpu.vector_store %arg8[%c0_6, %c0_7], %8 {strides = array<i32>} : memref<64x256xf32, #tpu.memory_space<vmem>>, vector<64x256xf32>,
    %c0_i32_8 = arith.constant 0 : i32
    %10 = arith.cmpi eq, %arg1, %c0_i32_8 : i32
    %11 = arith.extui %10 : i1 to i32
    %c0_i32_9 = arith.constant 0 : i32
    %12 = arith.cmpi ne, %11, %c0_i32_9 : i32
    scf.if %12 {
      %c0_10 = arith.constant 0 : index
      %c0_11 = arith.constant 0 : index
      %13 = vector.load %arg8[%c0_10, %c0_11] : memref<64x256xf32, #tpu.memory_space<vmem>>, vector<64x256xf32>
      %c0_12 = arith.constant 0 : index
      %c0_13 = arith.constant 0 : index
      %14 = vector.load %arg4[%c0_12, %c0_13] : memref<1x256xf32, #tpu.memory_space<vmem>>, vector<1x256xf32>
      %15 = vector.broadcast %14 : vector<1x256xf32> to vector<64x256xf32>
      %16 = arith.addf %13, %15 : vector<64x256xf32>
      %cst_14 = arith.constant 0.000000e+00 : f32
      %17 = vector.broadcast %cst_14 : f32 to vector<64x256xf32>
      %18 = arith.maximumf %16, %17 : vector<64x256xf32>
      %19 = arith.truncf %18 : vector<64x256xf32> to vector<64x256xbf16>
      %c0_15 = arith.constant 0 : index
      %c0_16 = arith.constant 0 : index
      %20 = vector.load %arg5[%c0_15, %c0_16] : memref<256x128xbf16, #tpu.memory_space<vmem>>, vector<256x128xbf16>
      %cst_17 = arith.constant dense<0.000000e+00> : vector<64x128xf32>
      %21 = tpu.matmul %19, %20, %cst_17 {dimension_numbers = #tpu.dot_dimension_numbers<[1], [0], [0], [1], [0, 0, 1, 1], [], []>} : vector<64x256xbf16>, vector<256x128xbf16>, vector<64x128xf32> -> vector<64x128xf32>
      %c0_18 = arith.constant 0 : index
      %c0_19 = arith.constant 0 : index
      %22 = vector.load %arg6[%c0_18, %c0_19] : memref<1x128xf32, #tpu.memory_space<vmem>>, vector<1x128xf32>
      %23 = vector.broadcast %22 : vector<1x128xf32> to vector<64x128xf32>
      %24 = arith.addf %21, %23 : vector<64x128xf32>
      %c0_20 = arith.constant 0 : index
      %c0_21 = arith.constant 0 : index
      %25 = vector.load %arg7[%c0_20, %c0_21] : memref<64x128xf32, #tpu.memory_space<vmem>>, vector<64x128xf32>
      tpu.vector_store %arg7[%c0_20, %c0_21], %24 {strides = array<i32>} : memref<64x128xf32, #tpu.memory_space<vmem>>, vector<64x128xf32>,
    } else {
    }
    return
  }
  func.func @transform_0(%arg0: i32, %arg1: i32) -> (i32, i32) {
    %c0_i32 = arith.constant 0 : i32
    return %arg0, %arg1 : i32, i32
  }
  func.func @transform_1(%arg0: i32, %arg1: i32) -> (i32, i32) {
    %c0_i32 = arith.constant 0 : i32
    %c0_i32_0 = arith.constant 0 : i32
    return %arg1, %c0_i32 : i32, i32
  }
  func.func @transform_2(%arg0: i32, %arg1: i32) -> (i32, i32) {
    %c0_i32 = arith.constant 0 : i32
    %c0_i32_0 = arith.constant 0 : i32
    %c0_i32_1 = arith.constant 0 : i32
    return %c0_i32, %c0_i32_0 : i32, i32
  }
  func.func @transform_3(%arg0: i32, %arg1: i32) -> (i32, i32) {
    %c0_i32 = arith.constant 0 : i32
    %c0_i32_0 = arith.constant 0 : i32
    %c0_i32_1 = arith.constant 0 : i32
    return %c0_i32, %c0_i32_0 : i32, i32
  }
  func.func @transform_4(%arg0: i32, %arg1: i32) -> (i32, i32) {
    %c0_i32 = arith.constant 0 : i32
    %c0_i32_0 = arith.constant 0 : i32
    %c0_i32_1 = arith.constant 0 : i32
    return %c0_i32, %c0_i32_0 : i32, i32
  }
  func.func @transform_5(%arg0: i32, %arg1: i32) -> (i32, i32) {
    %c0_i32 = arith.constant 0 : i32
    %c0_i32_0 = arith.constant 0 : i32
    return %arg0, %c0_i32 : i32, i32
  }
}

</mosaic_0001>

<bundles_post_ra>
// kernel: tpu_custom_call.1
= control target key start
LH: loop header
LB: loop body
LE: loop exit
PB: predicated region body
PF: predicated region fallthrough
CT: control target
= control target key end

     0   :  { %s2555_s0 = inlined_call_operand.hbm [shape: f32[128,512], index: 0, kind: input, shape index: {}]   ;;  %s2556_s1 = inlined_call_operand.hbm [shape: bf16[512,256], index: 1, kind: input, shape index: {}]   ;;  %s2557_s2 = inlined_call_operand.hbm [shape: f32[1,256], index: 2, kind: input, shape index: {}]   ;;  %s2558_s3 = inlined_call_operand.hbm [shape: bf16[256,128], index: 3, kind: input, shape index: {}]   ;;  %s2559_s4 = inlined_call_operand.vmem [shape: f32[1,128], index: 4, kind: input, shape index: {}]   ;;  %s2560_s5 = inlined_call_operand.hbm [shape: f32[128,128], index: 5, kind: output, shape index: {}]  }
   0x1   :  { %2561 = sst [smem:[#allocation16_spill]] %s2556_s1 }
   0x2   :  { %2562 = sst [smem:[#allocation17_spill]] %s2557_s2 }
   0x3   :  { %2563 = sst [smem:[#allocation18_spill]] %s2558_s3 }
   0x4   :  { %10 = vsyncpa [#allocation4], 0 }
   0x5   :  { %12 = vsyncpa [#allocation4 + $0x1], 0 }
   0x6   :  { %13 = vsyncpa [#allocation7], 0 }
   0x7   :  { %14 = vsyncpa [#allocation10], 0 }
   0x8   :  { %15 = vsyncpa [#allocation5], 0 }
   0x9   :  { %17 = vsyncpa [#allocation5 + $0x1], 0  ;;  %s2245_s18 = smov 0   ;;  %s2247_s19 = smov 0  }
   0xa   :  { %s2249_s20 = smov 0   ;;  %s2251_s21 = smov 0  }
   0xb   :  { %s2253_s22 = smov 0   ;;  %s2255_s23 = smov 0  }
   0xc LB: > { %s1449_s24 = sadd.s32 4294967295, %s2202_s23   ;;  %s1450_s25 = sadd.s32 4294967294, %s2202_s23   ;;  %s2202_s23 = sphi %s2255_s23, %s23_s23   ;;  %s2198_s22 = sphi %s2253_s22, %s2579_s22   ;;  %s2194_s21 = sphi %s2251_s21, %s2578_s21   ;;  %s2190_s20 = sphi %s2249_s20, %s2577_s20   ;;  %s2186_s19 = sphi %s2247_s19, %s2576_s19   ;;  %s2182_s18 = sphi %s2245_s18, %s2575_s18  }
   0xd   : > { %p57_p0 = scmp.ne.s32.totalorder %s2186_s19, %s2182_s18  ;;  %p2279_p1 = scmp.eq.s32.totalorder %s1449_s24, 0 }
   0xe   : > { %p2283_p2 = scmp.eq.s32.totalorder %s1449_s24, 1  ;;  %p176_p3 = scmp.eq.s32.totalorder %s1450_s25, 1 }
   0xf   : > { %p2289_p4 = por %p2279_p1, %p57_p0  ;;  %p1451_p5 = scmp.ge.s32.totalorder %s2202_s23, 1 }
  0x10   : > { %p2294_p6 = por %p176_p3, %p57_p0  ;;  %p183_p7 = scmp.lt.s32.totalorder %s2202_s23, 3 }
  0x11   : > { %s2568_s1 = sld [smem:[#allocation16_spill]]  ;;  %s2204_s9 = smov [#allocation6]  }
  0x12   : > { %p2302_p8 = pnand %p1451_p5, %p183_p7  ;;  %s200_s10 = sshll.u32 %s2204_s9, 4  ;;  %s201_s10 = int_to_ptr.vmem [resolvable:$true] %s200_s10 }
  0x13   : > { %p1455_p11 = scmp.ge.s32.totalorder %s2202_s23, 2  ;;  %s2571_s2 = sld [smem:[#allocation17_spill]] }
  0x14   : > { %p1906_p9 = pneg %p2302_p8  ;;  %s2205_s15 = smov 128  }
  0x15   : > { %s2206_s16 = smov 8   ;;  %s2207_s17 = smov [#allocation8]  }
  0x16   : > { %p2310_p10 = pnand %p1906_p9, %p2279_p1  ;;  %s215_s24 = sshll.u32 %s2207_s17, 4  ;;  %s216_s24 = int_to_ptr.vmem [resolvable:$true] %s215_s24 }
  0x17   : > { %s198_s7 = sshll.u32 %s2568_s1, 4  ;;  %s2572_s3 = sld [smem:[#allocation18_spill]]  ;;  %s199_s7 = int_to_ptr.hbm [resolvable:$true] %s198_s7 }
  0x18   : > { %1909 = dma.hbm_to_vmem [thread:$0]  (!%p2310_p10), %s199_s7, 8192, %s201_s10, [#allocation7], %s2205_s15, %s2205_s15, %s2206_s16  }
  0x19   : > { %s213_s14 = sshll.u32 %s2571_s2, 4  ;;  %s2208_s9 = smov [#allocation9]   ;;  %s214_s14 = int_to_ptr.hbm [resolvable:$true] %s213_s14 }
  0x1a   : > { %1912 = dma.hbm_to_vmem [thread:$0]  (!%p2310_p10), %s214_s14, 32, %s216_s24, [#allocation7]  }
  0x1b   : > { %s226_s12 = sshll.u32 %s2208_s9, 4  ;;  %s2209_s13 = smov 64   ;;  %s227_s12 = int_to_ptr.vmem [resolvable:$true] %s226_s12 }
  0x1c   : > { %s2210_s7 = smov 4   ;;  %s44_s10 = sadd.s32 1, %s2190_s20 }
  0x1d   : > { %s224_s6 = sshll.u32 %s2572_s3, 4  ;;  %s35_s15 = sadd.s32 1, %s2198_s22  ;;  %s225_s6 = int_to_ptr.hbm [resolvable:$true] %s224_s6 }
  0x1e   : > { %1915 = dma.hbm_to_vmem [thread:$0]  (!%p2310_p10), %s225_s6, 2048, %s227_s12, [#allocation10], %s2209_s13, %s2209_s13, %s2210_s7  }
  0x1f   : > { %p51_p12 = scmp.ne.s32.totalorder %s2190_s20, %s2186_s19  ;;  %p37_p13 = scmp.ge.s32.totalorder %s35_s15, 2 }
  0x20   : > { %p52_p0 = scmp.eq.s32.totalorder %s2202_s23, 0  ;;  %p1927_p5 = scmp.lt.s32.totalorder %s2202_s23, 2 }
  0x21   : > { %p2334_p3 = por %p2283_p2, %p51_p12  ;;  %s2581_s15 = smov (%p37_p13, %s35_s15), 0 }
  0x22   : > { %p2341_p7 = por %p52_p0, %p51_p12  ;;  %s243_s11 = sand.u32 1, %s2190_s20  }
  0x23   : > { %s39_s17 = ssub.s32 %s2198_s22, %s2581_s15  ;;  %s1456_s24 = sshll.u32 %s243_s11, 8 }
  0x24   : > { %p42_p9 = scmp.eq.s32.totalorder %s39_s17, 0  ;;  %s1792_s25 = sshll.u32 %s2198_s22, 8 }
  0x25   : > { %s255_s9 = scalar_lea.hbm %s2555_s0, %s1792_s25  ;;  %s247_s12 = scalar_lea.vmem [#allocation3], %s1456_s24 }
  0x26   : > { %s2350_s27 = scalar_select %p42_p9, %s2190_s20, %s44_s10  }
  0x27   : > { %s258_s13 = sshll.u32 %s247_s12, 4  ;;  %s256_s7 = sshll.u32 %s255_s9, 4  ;;  %s259_s13 = int_to_ptr.vmem [resolvable:$true] %s258_s13  ;;  %s257_s7 = int_to_ptr.hbm [resolvable:$true] %s256_s7 }
  0x28   : > { %p1917_p2 = pnand %p1927_p5, %p2341_p7  ;;  %s244_s1 = scalar_lea.sflag [#allocation4], %s243_s11 }
  0x29   : > { %s2211_s2 = smov 512   ;;  %s2212_s3 = smov 32  }
  0x2a   : > { %1919 = dma.hbm_to_vmem [thread:$0]  (!%p1917_p2), %s257_s7, 4096, %s259_s13, %s244_s1, %s2211_s2, %s2211_s2, %s2212_s3  }
  0x2b   : > { %270 = sbr.rel (%p2302_p8) target bundleno = 521 (0x209), region = 40  ;;  %s2362_s10 = sand.u32 (!%p2302_p8), 1, %s2186_s19  }
  0x2c   : > { %s1461_s17 = sshll.u32 (!%p2302_p8), %s2362_s10, 8  ;;  %s273_s24 = scalar_lea.sflag (!%p2302_p8), [#allocation4], %s2362_s10 }
  0x2d   : > { %s2366_s25 = scalar_lea.vmem (!%p2302_p8), [#allocation3], %s1461_s17 }
  0x30   : > { %2165 = dma.done.wait (%p2289_p4), %s273_s24, 4096  }
  0x31   : > { %2167 = vsyncadd (%p2289_p4), %s273_s24, 4294963200 }
  0x32   : > { %2169 = dma.done.wait (%p2279_p1), [#allocation7], 8224  }
  0x33   : > { %2171 = vsyncadd (%p2279_p1), [#allocation7], 4294959072 }
  0x34   : > { %2173 = dma.done.wait (%p2279_p1), [#allocation10], 2048  }
  0x35   : > { %2175 = vsyncadd (%p2279_p1), [#allocation10], 4294965248  ;;  %v1524_v0 = vld [vmem:[#allocation6 + $0x70] sm:$0xf]  ;;  %v1808_v1 = vld [vmem:[#allocation6 + $0x74] sm:$0xf0] }
  0x36   : > { %v1588_v2 = vld [vmem:[#allocation6 + $0xf0] sm:$0xf]  ;;  %v1525_v3 = vor.u32 %v1808_v1, %v1524_v0  ;;  %v1824_v4 = vld [vmem:[#allocation6 + $0xf4] sm:$0xf0]  ;;  %v1516_v5 = vld [vmem:[#allocation6 + $0x60] sm:$0xf] }
  0x37   : > { %v1806_v6 = vld [vmem:[#allocation6 + $0x64] sm:$0xf0]  ;;  %v1589_v7 = vor.u32 %v1824_v4, %v1588_v2  ;;  %v1580_v8 = vld [vmem:[#allocation6 + $0xe0] sm:$0xf]  ;;  %v1508_v12 = vld [vmem:[#allocation6 + $0x50] sm:$0xf] }
  0x38   : > { %v1822_v9 = vld [vmem:[#allocation6 + $0xe4] sm:$0xf0]  ;;  %1874 = vmatpush.bf16.msra.mxu2 %v1525_v3  ;;  %v1517_v10 = vor.u32 %v1806_v6, %v1516_v5  ;;  %791 = vmatpush.bf16.msra.mxu0 %v1525_v3  ;;  %v1804_v13 = vld [vmem:[#allocation6 + $0x54] sm:$0xf0]  ;;  %v1572_v14 = vld [vmem:[#allocation6 + $0xd0] sm:$0xf] }
  0x39   : > { %1882 = vmatpush.bf16.msra.mxu3 %v1589_v7  ;;  %v1581_v11 = vor.u32 %v1822_v9, %v1580_v8  ;;  %820 = vmatpush.bf16.msra.mxu1 %v1589_v7  ;;  %v1820_v15 = vld [vmem:[#allocation6 + $0xd4] sm:$0xf0]  ;;  %v1509_v16 = vor.u32 %v1804_v13, %v1508_v12  ;;  %v1500_v18 = vld [vmem:[#allocation6 + $0x40] sm:$0xf]  ;;  %v1802_v19 = vld [vmem:[#allocation6 + $0x44] sm:$0xf0] }
  0x3a   : > { %v1573_v17 = vor.u32 %v1820_v15, %v1572_v14  ;;  %v1564_v20 = vld [vmem:[#allocation6 + $0xc0] sm:$0xf]  ;;  %v1818_v21 = vld [vmem:[#allocation6 + $0xc4] sm:$0xf0]  ;;  %v1501_v22 = vor.u32 %v1802_v19, %v1500_v18  ;;  %v1492_v24 = vld [vmem:[#allocation6 + $0x30] sm:$0xf] }
  0x3b   : > { %v1565_v23 = vor.u32 %v1818_v21, %v1564_v20  ;;  %v1800_v25 = vld [vmem:[#allocation6 + $0x34] sm:$0xf0]  ;;  %v1556_v26 = vld [vmem:[#allocation6 + $0xb0] sm:$0xf]  ;;  %v1484_v30 = vld [vmem:[#allocation6 + $0x20] sm:$0xf] }
  0x3c   : > { %1875 = vmatpush.bf16.msra.mxu2 %v1517_v10  ;;  %792 = vmatpush.bf16.msra.mxu0 %v1517_v10  ;;  %v1816_v27 = vld [vmem:[#allocation6 + $0xb4] sm:$0xf0]  ;;  %v1493_v28 = vor.u32 %v1800_v25, %v1492_v24  ;;  %v1798_v31 = vld [vmem:[#allocation6 + $0x24] sm:$0xf0]  ;;  %v1548_v32 = vld [vmem:[#allocation6 + $0xa0] sm:$0xf] }
  0x3d   : > { %1883 = vmatpush.bf16.msra.mxu3 %v1581_v11  ;;  %821 = vmatpush.bf16.msra.mxu1 %v1581_v11  ;;  %v1557_v29 = vor.u32 %v1816_v27, %v1556_v26  ;;  %v1814_v33 = vld [vmem:[#allocation6 + $0xa4] sm:$0xf0]  ;;  %v1485_v34 = vor.u32 %v1798_v31, %v1484_v30  ;;  %v1476_v36 = vld [vmem:[#allocation6 + $0x10] sm:$0xf]  ;;  %v1796_v37 = vld [vmem:[#allocation6 + $0x14] sm:$0xf0] }
  0x3e   : > { %v1549_v35 = vor.u32 %v1814_v33, %v1548_v32  ;;  %v1540_v38 = vld [vmem:[#allocation6 + $0x90] sm:$0xf]  ;;  %v1812_v39 = vld [vmem:[#allocation6 + $0x94] sm:$0xf0]  ;;  %v1477_v40 = vor.u32 %v1796_v37, %v1476_v36  ;;  %v1468_v42 = vld [vmem:[#allocation6] sm:$0xf] }
  0x3f   : > { %v1541_v41 = vor.u32 %v1812_v39, %v1540_v38  ;;  %v1794_v43 = vld [vmem:[#allocation6 + $0x4] sm:$0xf0]  ;;  %v1532_v44 = vld [vmem:[#allocation6 + $0x80] sm:$0xf]  ;;  %v1652_v46 = vld [vmem:[#allocation6 + $0x170] sm:$0xf] }
  0x40   : > { %1876 = vmatpush.bf16.msra.mxu2 %v1509_v16  ;;  %793 = vmatpush.bf16.msra.mxu0 %v1509_v16  ;;  %v1810_v45 = vld [vmem:[#allocation6 + $0x84] sm:$0xf0]  ;;  %v1840_v47 = vld [vmem:[#allocation6 + $0x174] sm:$0xf0]  ;;  %v1716_v48 = vld [vmem:[#allocation6 + $0x1f0] sm:$0xf]  ;;  %v1469_v50 = vor.u32 %v1794_v43, %v1468_v42 }
  0x41   : > { %1884 = vmatpush.bf16.msra.mxu3 %v1573_v17  ;;  %822 = vmatpush.bf16.msra.mxu1 %v1573_v17  ;;  %v1856_v49 = vld [vmem:[#allocation6 + $0x1f4] sm:$0xf0]  ;;  %v375_v51 = vld [vmem:[%s2366_s25 + $0x80] sm:$0xff]  ;;  %v1533_v53 = vor.u32 %v1810_v45, %v1532_v44  ;;  %v376_v54 = vld [vmem:[%s2366_s25 + $0x88] sm:$0xff]  ;;  %v1653_v56 = vor.u32 %v1840_v47, %v1652_v46  ;;  %s1465_s3 = sshll.u32 %s2362_s10, 6  ;;  %s1873_s28 = sshll.u32 %s2194_s21, 6 }
  0x42   : > { %v379_v52 = vld [vmem:[%s2366_s25 + $0xa0] sm:$0xff]  ;;  %v380_v55 = vld [vmem:[%s2366_s25 + $0xa8] sm:$0xff]  ;;  %v1717_v57 = vor.u32 %v1856_v49, %v1716_v48  ;;  %v1636_v2 = vld [vmem:[#allocation6 + $0x150] sm:$0xf]  ;;  %s2506_s26 = scalar_lea.vmem [#allocation11], %s1465_s3  ;;  %s1330_s11 = scalar_lea.hbm %s2560_s5, %s1873_s28 }
  0x43   : > { %v1644_v58 = vld [vmem:[#allocation6 + $0x160] sm:$0xf]  ;;  %v1838_v59 = vld [vmem:[#allocation6 + $0x164] sm:$0xf0]  ;;  %v2384_v60 = vpack.c.bf16 %v379_v52, %v375_v51  ;;  %v2386_v63 = vpack.c.bf16 %v380_v55, %v376_v54  ;;  %v1836_v3 = vld [vmem:[#allocation6 + $0x154] sm:$0xf0] }
  0x44   : > { %1877 = vmatpush.bf16.msra.mxu2 %v1501_v22  ;;  %794 = vmatpush.bf16.msra.mxu0 %v1501_v22  ;;  %v1708_v61 = vld [vmem:[#allocation6 + $0x1e0] sm:$0xf]  ;;  %v1854_v62 = vld [vmem:[#allocation6 + $0x1e4] sm:$0xf0]  ;;  %v1645_v0 = vor.u32 %v1838_v59, %v1644_v58  ;;  %v1700_v4 = vld [vmem:[#allocation6 + $0x1d0] sm:$0xf]  ;;  %v1637_v6 = vor.u32 %v1836_v3, %v1636_v2 }
  0x45   : > { %1885 = vmatpush.bf16.msra.mxu3 %v1565_v23  ;;  %823 = vmatpush.bf16.msra.mxu1 %v1565_v23  ;;  %v1709_v1 = vor.u32 %v1854_v62, %v1708_v61  ;;  %v1852_v5 = vld [vmem:[#allocation6 + $0x1d4] sm:$0xf0]  ;;  %v1628_v7 = vld [vmem:[#allocation6 + $0x140] sm:$0xf]  ;;  %v1834_v11 = vld [vmem:[#allocation6 + $0x144] sm:$0xf0] }
  0x46   : > { %v359_v8 = vld [vmem:[%s2366_s25] sm:$0xff]  ;;  %v1701_v10 = vor.u32 %v1852_v5, %v1700_v4  ;;  %v360_v13 = vld [vmem:[%s2366_s25 + $0x8] sm:$0xff]  ;;  %v1629_v18 = vor.u32 %v1834_v11, %v1628_v7  ;;  %v1620_v20 = vld [vmem:[#allocation6 + $0x130] sm:$0xf]  ;;  %s1331_s30 = sshll.u32 %s2506_s26, 4  ;;  %s1333_s6 = sshll.u32 %s1330_s11, 4  ;;  %s1332_s30 = int_to_ptr.vmem [resolvable:$true] %s1331_s30  ;;  %s1334_s6 = int_to_ptr.hbm [resolvable:$true] %s1333_s6 }
  0x47   : > { %v363_v9 = vld [vmem:[%s2366_s25 + $0x20] sm:$0xff]  ;;  %v364_v14 = vld [vmem:[%s2366_s25 + $0x28] sm:$0xff]  ;;  %v1832_v21 = vld [vmem:[#allocation6 + $0x134] sm:$0xf0]  ;;  %s1319_s9 = scalar_lea.sflag [#allocation5], %s2362_s10  ;;  %s2126_s12 = sshra.s32 %s1334_s6, 4  ;;  %s2127_s12 = int_to_ptr.hbm [resolvable:$true] %s2126_s12 }
  0x48   : > { %1878 = vmatpush.bf16.msra.mxu2 %v1493_v28  ;;  %795 = vmatpush.bf16.msra.mxu0 %v1493_v28  ;;  %v2392_v12 = vpack.c.bf16 %v363_v9, %v359_v8  ;;  %v1692_v15 = vld [vmem:[#allocation6 + $0x1c0] sm:$0xf]  ;;  %v1850_v16 = vld [vmem:[#allocation6 + $0x1c4] sm:$0xf0]  ;;  %v2396_v17 = vpack.c.bf16 %v364_v14, %v360_v13  ;;  %v1684_v22 = vld [vmem:[#allocation6 + $0x1b0] sm:$0xf]  ;;  %v1621_v28 = vor.u32 %v1832_v21, %v1620_v20  ;;  %p2133_p10 = scmp.lt.s32.totalorder %s2127_s12, %s2560_s5 }
  0x49   : > { %1886 = vmatpush.bf16.msra.mxu3 %v1557_v29  ;;  %824 = vmatpush.bf16.msra.mxu1 %v1557_v29  ;;  %v1693_v19 = vor.u32 %v1850_v16, %v1692_v15  ;;  %v1848_v23 = vld [vmem:[#allocation6 + $0x1b4] sm:$0xf0]  ;;  %v383_v24 = vld [vmem:[%s2366_s25 + $0xc0] sm:$0xff]  ;;  %v384_v26 = vld [vmem:[%s2366_s25 + $0xc8] sm:$0xff]  ;;  %s2128_s21 = scalar_lea.hbm %s2127_s12, 64  ;;  %s2132_s17 = scalar_lea.hbm %s2560_s5, 128 }
  0x4a   : > { %v387_v25 = vld [vmem:[%s2366_s25 + $0xe0] sm:$0xff]  ;;  %v388_v27 = vld [vmem:[%s2366_s25 + $0xe8] sm:$0xff]  ;;  %v1685_v29 = vor.u32 %v1848_v23, %v1684_v22  ;;  %v1604_v38 = vld [vmem:[#allocation6 + $0x110] sm:$0xf]  ;;  %p2129_p1 = scmp.ne.s32.totalorder %s2127_s12, %s2128_s21  ;;  %p2134_p12 = scmp.lt.s32.totalorder %s2132_s17, %s2128_s21 }
  0x4b   : > { %v1612_v30 = vld [vmem:[#allocation6 + $0x120] sm:$0xf]  ;;  %v1830_v31 = vld [vmem:[#allocation6 + $0x124] sm:$0xf0]  ;;  %v2404_v32 = vpack.c.bf16 %v387_v25, %v383_v24  ;;  %v1828_v39 = vld [vmem:[#allocation6 + $0x114] sm:$0xf0] }
  0x4c   : > { %1879 = vmatpush.bf16.msra.mxu2 %v1485_v34  ;;  %796 = vmatpush.bf16.msra.mxu0 %v1485_v34  ;;  %v1676_v33 = vld [vmem:[#allocation6 + $0x1a0] sm:$0xf]  ;;  %v1846_v34 = vld [vmem:[#allocation6 + $0x1a4] sm:$0xf0]  ;;  %v1613_v36 = vor.u32 %v1830_v31, %v1612_v30  ;;  %v1605_v44 = vor.u32 %v1828_v39, %v1604_v38  ;;  %v1654_v54 = vld [vmem:[#allocation6 + $0x178] sm:$0xf0]  ;;  %p2130_p4 = pnand %p2129_p1, %p2334_p3  ;;  %p2135_p13 = por %p2134_p12, %p2133_p10 }
  0x4d   : > { %1887 = vmatpush.bf16.msra.mxu3 %v1549_v35  ;;  %825 = vmatpush.bf16.msra.mxu1 %v1549_v35  ;;  %v2406_v35 = vpack.c.bf16 %v388_v27, %v384_v26  ;;  %v1677_v37 = vor.u32 %v1846_v34, %v1676_v33  ;;  %v1596_v42 = vld [vmem:[#allocation6 + $0x100] sm:$0xf]  ;;  %v1826_v43 = vld [vmem:[#allocation6 + $0x104] sm:$0xf0]  ;;  %v1855_v55 = vld [vmem:[#allocation6 + $0x1f4] sm:$0xf] }
  0x4e   : > { %v1660_v45 = vld [vmem:[#allocation6 + $0x180] sm:$0xf]  ;;  %v1842_v46 = vld [vmem:[#allocation6 + $0x184] sm:$0xf0]  ;;  %v1807_v58 = vld [vmem:[#allocation6 + $0x74] sm:$0xf]  ;;  %v1597_v62 = vor.u32 %v1826_v43, %v1596_v42  ;;  %p2131_p8 = pneg %p2130_p4 }
  0x4f   : > { %v367_v47 = vld [vmem:[%s2366_s25 + $0x40] sm:$0xff]  ;;  %v368_v52 = vld [vmem:[%s2366_s25 + $0x48] sm:$0xff]  ;;  %v1526_v59 = vld [vmem:[#allocation6 + $0x78] sm:$0xf0]  ;;  %v1661_v2 = vor.u32 %v1842_v46, %v1660_v45 }
  0x50   : > { %1880 = vmatpush.bf16.msra.mxu2 %v1477_v40  ;;  %797 = vmatpush.bf16.msra.mxu0 %v1477_v40  ;;  %v1668_v40 = vld [vmem:[#allocation6 + $0x190] sm:$0xf]  ;;  %v371_v48 = vld [vmem:[%s2366_s25 + $0x60] sm:$0xff]  ;;  %v1823_v61 = vld [vmem:[#allocation6 + $0xf4] sm:$0xf]  ;;  %p2136_p0 = pnand %p2135_p13, %p2131_p8 }
  0x51   : > { %1888 = vmatpush.bf16.msra.mxu3 %v1541_v41  ;;  %826 = vmatpush.bf16.msra.mxu1 %v1541_v41  ;;  %v1844_v41 = vld [vmem:[#allocation6 + $0x194] sm:$0xf0]  ;;  %v2412_v51 = vpack.c.bf16 %v371_v48, %v367_v47  ;;  %v361_v5 = vld [vmem:[%s2366_s25 + $0x10] sm:$0xff]  ;;  %v1837_v7 = vld [vmem:[#allocation6 + $0x164] sm:$0xf] }
  0x52   : > { %v1669_v49 = vor.u32 %v1844_v41, %v1668_v40  ;;  %v1646_v8 = vld [vmem:[#allocation6 + $0x168] sm:$0xf0]  ;;  %v365_v9 = vld [vmem:[%s2366_s25 + $0x30] sm:$0xff]  ;;  %v362_v13 = vld [vmem:[%s2366_s25 + $0x18] sm:$0xff] }
  0x53   : > { %v1710_v11 = vld [vmem:[#allocation6 + $0x1e8] sm:$0xf0]  ;;  %v366_v14 = vld [vmem:[%s2366_s25 + $0x38] sm:$0xff]  ;;  %v1649_v15 = vor.u32 %v1837_v7, %v1646_v8  ;;  %v2424_v16 = vpack.c.bf16 %v365_v9, %v361_v5  ;;  %v1851_v22 = vld [vmem:[#allocation6 + $0x1d4] sm:$0xf] }
  0x54   : > { %1881 = vmatpush.bf16.msra.mxu2 %v1469_v50  ;;  %798 = vmatpush.bf16.msra.mxu0 %v1469_v50  ;;  %v1839_v50 = vld [vmem:[#allocation6 + $0x174] sm:$0xf]  ;;  %v1638_v20 = vld [vmem:[#allocation6 + $0x158] sm:$0xf0]  ;;  %v2426_v21 = vpack.c.bf16 %v366_v14, %v362_v13  ;;  %v1805_v25 = vld [vmem:[#allocation6 + $0x64] sm:$0xf] }
  0x55   : > { %1889 = vmatpush.bf16.msra.mxu3 %v1533_v53  ;;  %827 = vmatpush.bf16.msra.mxu1 %v1533_v53  ;;  %v372_v53 = vld [vmem:[%s2366_s25 + $0x68] sm:$0xff]  ;;  %v1657_v3 = vor.u32 %v1839_v50, %v1654_v54  ;;  %v1702_v23 = vld [vmem:[#allocation6 + $0x1d8] sm:$0xf0]  ;;  %v1821_v27 = vld [vmem:[#allocation6 + $0xe4] sm:$0xf] }
  0x56   : > { %v1518_v26 = vld [vmem:[#allocation6 + $0x68] sm:$0xf0]  ;;  %v1849_v34 = vld [vmem:[#allocation6 + $0x1c4] sm:$0xf]  ;;  %v1831_v38 = vld [vmem:[#allocation6 + $0x134] sm:$0xf] }
  0x57   : > { %809 = vmatmul.bf16.vlgmr.msra.gmra.mxu2 %v2384_v60  ;;  %799 = vmatmul.bf16.vlgmr.msra.gmra.mxu0 %v2392_v12  ;;  %v1630_v30 = vld [vmem:[#allocation6 + $0x148] sm:$0xf0]  ;;  %v1521_v31 = vor.u32 %v1805_v25, %v1518_v26  ;;  %v1803_v39 = vld [vmem:[#allocation6 + $0x54] sm:$0xf]  ;;  %v1510_v40 = vld [vmem:[#allocation6 + $0x58] sm:$0xf0] }
  0x58   : > { %849 = vmatpush.bf16.msrb.mxu2 %v1653_v56  ;;  %838 = vmatmul.bf16.vlgmr.msra.gmra.mxu3 %v2386_v63  ;;  %v1718_v56 = vld [vmem:[#allocation6 + $0x1f8] sm:$0xf0]  ;;  %v1582_v33 = vld [vmem:[#allocation6 + $0xe8] sm:$0xf0]  ;;  %v1513_v43 = vor.u32 %v1803_v39, %v1510_v40  ;;  %v1847_v47 = vld [vmem:[#allocation6 + $0x1b4] sm:$0xf] }
  0x59   : > { %878 = vmatpush.bf16.msrb.mxu3 %v1717_v57  ;;  %828 = vmatmul.bf16.vlgmr.msra.gmra.mxu1 %v2396_v17  ;;  %v2416_v57 = vpack.c.bf16 %v372_v53, %v368_v52  ;;  %v1622_v42 = vld [vmem:[#allocation6 + $0x138] sm:$0xf0]  ;;  %v1502_v50 = vld [vmem:[#allocation6 + $0x48] sm:$0xf0]  ;;  %v1817_v53 = vld [vmem:[#allocation6 + $0xc4] sm:$0xf] }
  0x5a   : > { %v1574_v45 = vld [vmem:[#allocation6 + $0xd8] sm:$0xf0]  ;;  %v1566_v54 = vld [vmem:[#allocation6 + $0xc8] sm:$0xf0]  ;;  %v373_v5 = vld [vmem:[%s2366_s25 + $0x70] sm:$0xff] }
  0x5b   : > { %v1686_v52 = vld [vmem:[#allocation6 + $0x1b8] sm:$0xf0]  ;;  %v1678_v7 = vld [vmem:[#allocation6 + $0x1a8] sm:$0xf0]  ;;  %v1827_v25 = vld [vmem:[#allocation6 + $0x114] sm:$0xf] }
  0x5c   : > { %850 = vmatpush.bf16.msrb.mxu2 %v1645_v0  ;;  %v1529_v0 = vor.u32 %v1807_v58, %v1526_v59  ;;  %v1625_v58 = vor.u32 %v1831_v38, %v1622_v42  ;;  %v1829_v59 = vld [vmem:[#allocation6 + $0x124] sm:$0xf]  ;;  %v370_v8 = vld [vmem:[%s2366_s25 + $0x58] sm:$0xff] }
  0x5d   : > { %879 = vmatpush.bf16.msrb.mxu3 %v1709_v1  ;;  %v1590_v1 = vld [vmem:[#allocation6 + $0xf8] sm:$0xf0]  ;;  %v1825_v39 = vld [vmem:[#allocation6 + $0x104] sm:$0xf] }
  0x5e   : > { %v1593_v4 = vor.u32 %v1823_v61, %v1590_v1  ;;  %907 = vmatpush.bf16.msrb.mxu0 %v1529_v0  ;;  %v1569_v61 = vor.u32 %v1817_v53, %v1566_v54  ;;  %v1494_v0 = vld [vmem:[#allocation6 + $0x38] sm:$0xf0]  ;;  %v1689_v1 = vor.u32 %v1847_v47, %v1686_v52  ;;  %v1793_v42 = vld [vmem:[#allocation6 + $0x4] sm:$0xf]  ;;  %v377_v53 = vld [vmem:[%s2366_s25 + $0x90] sm:$0xff] }
  0x5f   : > { %v374_v9 = vld [vmem:[%s2366_s25 + $0x78] sm:$0xff]  ;;  %v1841_v47 = vld [vmem:[#allocation6 + $0x184] sm:$0xf]  ;;  %v381_v54 = vld [vmem:[%s2366_s25 + $0xb0] sm:$0xff] }
  0x60   : > { %851 = vmatpush.bf16.msrb.mxu2 %v1637_v6  ;;  %v1721_v6 = vor.u32 %v1855_v55, %v1718_v56  ;;  %936 = vmatpush.bf16.msrb.mxu1 %v1593_v4  ;;  %v369_v56 = vld [vmem:[%s2366_s25 + $0x50] sm:$0xff]  ;;  %v1558_v4 = vld [vmem:[#allocation6 + $0xb8] sm:$0xf0] }
  0x61   : > { %880 = vmatpush.bf16.msrb.mxu3 %v1701_v10  ;;  %v1853_v10 = vld [vmem:[#allocation6 + $0x1e4] sm:$0xf]  ;;  %v2434_v14 = vpack.c.bf16 %v373_v5, %v369_v56  ;;  %v1606_v26 = vld [vmem:[#allocation6 + $0x118] sm:$0xf0]  ;;  %v1858_v5 = vld [vmem:[#allocation9 + $0x8] sm:$0xff] }
  0x62   : > { %908 = vmatpush.bf16.msrb.mxu0 %v1521_v31  ;;  %v1795_v31 = vld [vmem:[#allocation6 + $0x14] sm:$0xf]  ;;  %v1542_v38 = vld [vmem:[#allocation6 + $0x98] sm:$0xf0] }
  0x63   : > { %v382_v56 = vld [vmem:[%s2366_s25 + $0xb8] sm:$0xff] }
  0x64   : > { %852 = vmatpush.bf16.msrb.mxu2 %v1629_v18  ;;  %v1713_v18 = vor.u32 %v1853_v10, %v1710_v11 }
  0x65   : > { %881 = vmatpush.bf16.msrb.mxu3 %v1693_v19  ;;  %v1835_v19 = vld [vmem:[#allocation6 + $0x154] sm:$0xf] }
  0x66   : > { %v1641_v24 = vor.u32 %v1835_v19, %v1638_v20  ;;  %909 = vmatpush.bf16.msrb.mxu0 %v1513_v43  ;;  %v1797_v19 = vld [vmem:[#allocation6 + $0x24] sm:$0xf]  ;;  %v1486_v20 = vld [vmem:[#allocation6 + $0x28] sm:$0xf0] }
  0x67   : > { %814 = vmatmul.bf16.gmra.mxu2 %v2404_v32  ;;  %804 = vmatmul.bf16.gmra.mxu0 %v2412_v51  ;;  %v1470_v43 = vld [vmem:[#allocation6 + $0x8] sm:$0xf0] }
  0x68   : > { %853 = vmatpush.bf16.msrb.mxu2 %v1621_v28  ;;  %843 = vmatmul.bf16.gmra.mxu3 %v2406_v35  ;;  %v1705_v28 = vor.u32 %v1851_v22, %v1702_v23  ;;  %v1813_v22 = vld [vmem:[#allocation6 + $0xa4] sm:$0xf]  ;;  %v1489_v23 = vor.u32 %v1797_v19, %v1486_v20 }
  0x69   : > { %882 = vmatpush.bf16.msrb.mxu3 %v1685_v29  ;;  %833 = vmatmul.bf16.gmra.mxu1 %v2416_v57  ;;  %v1833_v29 = vld [vmem:[#allocation6 + $0x144] sm:$0xf] }
  0x6a   : > { %v1633_v41 = vor.u32 %v1833_v29, %v1630_v30  ;;  %v1609_v29 = vor.u32 %v1827_v25, %v1606_v26  ;;  %v1670_v30 = vld [vmem:[#allocation6 + $0x198] sm:$0xf0]  ;;  %v2472_v26 = vld [vmem:[#allocation8] sm:$0x3] }
  0x6c   : > { %854 = vmatpush.bf16.msrb.mxu2 %v1613_v36  ;;  %v1694_v36 = vld [vmem:[#allocation6 + $0x1c8] sm:$0xf0] }
  0x6d   : > { %883 = vmatpush.bf16.msrb.mxu3 %v1677_v37  ;;  %v1585_v37 = vor.u32 %v1821_v27, %v1582_v33  ;;  %v1697_v46 = vor.u32 %v1849_v34, %v1694_v36  ;;  %v1478_v33 = vld [vmem:[#allocation6 + $0x18] sm:$0xf0] }
  0x6e   : > { %v1481_v36 = vor.u32 %v1795_v31, %v1478_v33  ;;  %v1870_v31 = vld [vmem:[#allocation9 + $0x68] sm:$0xff] }
  0x6f   : > { %937 = vmatpush.bf16.msrb.mxu1 %v1585_v37  ;;  %v1811_v37 = vld [vmem:[#allocation6 + $0x94] sm:$0xf] }
  0x70   : > { %855 = vmatpush.bf16.msrb.mxu2 %v1605_v44  ;;  %v1819_v44 = vld [vmem:[#allocation6 + $0xd4] sm:$0xf]  ;;  %v1545_v40 = vor.u32 %v1811_v37, %v1542_v38 }
  0x71   : > { %884 = vmatpush.bf16.msrb.mxu3 %v1669_v49  ;;  %v1577_v48 = vor.u32 %v1819_v44, %v1574_v45  ;;  %v1801_v49 = vld [vmem:[#allocation6 + $0x44] sm:$0xf] }
  0x72   : > { %v1505_v55 = vor.u32 %v1801_v49, %v1502_v50  ;;  %v1809_v45 = vld [vmem:[#allocation6 + $0x84] sm:$0xf]  ;;  %v1662_v49 = vld [vmem:[#allocation6 + $0x188] sm:$0xf0] }
  0x73   : > { %938 = vmatpush.bf16.msrb.mxu1 %v1577_v48  ;;  %v1473_v48 = vor.u32 %v1793_v42, %v1470_v43  ;;  %v1665_v52 = vor.u32 %v1841_v47, %v1662_v49 }
  0x74   : > { %856 = vmatpush.bf16.msrb.mxu2 %v1597_v62  ;;  %v1799_v62 = vld [vmem:[#allocation6 + $0x34] sm:$0xf]  ;;  %910 = vmatpush.bf16.msrb.mxu0 %v1505_v55  ;;  %v378_v55 = vld [vmem:[%s2366_s25 + $0x98] sm:$0xff] }
  0x75   : > { %885 = vmatpush.bf16.msrb.mxu3 %v1661_v2  ;;  %v1614_v2 = vld [vmem:[#allocation6 + $0x128] sm:$0xf0]  ;;  %v1497_v10 = vor.u32 %v1799_v62, %v1494_v0  ;;  %v389_v62 = vld [vmem:[%s2366_s25 + $0xf0] sm:$0xff]  ;;  %v386_v0 = vld [vmem:[%s2366_s25 + $0xd8] sm:$0xff] }
  0x76   : > { %v1617_v11 = vor.u32 %v1829_v59, %v1614_v2  ;;  %v402_v59 = vpack.c.bf16 %v382_v56, %v378_v55 }
  0x77   : > { %857 = vmatmul.bf16.vlgmr.msrb.gmra.mxu2 %v2424_v16  ;;  %939 = vmatpush.bf16.msrb.mxu1 %v1569_v61  ;;  %v385_v61 = vld [vmem:[%s2366_s25 + $0xd0] sm:$0xff] }
  0x78   : > { %965 = vmatpush.bf16.msra.mxu2 %v1657_v3  ;;  %886 = vmatmul.bf16.vlgmr.msrb.gmra.mxu3 %v2426_v21  ;;  %v1815_v3 = vld [vmem:[#allocation6 + $0xb4] sm:$0xf]  ;;  %v405_v2 = vpack.c.bf16 %v389_v62, %v385_v61 }
  0x79   : > { %994 = vmatpush.bf16.msra.mxu3 %v1721_v6  ;;  %v1845_v6 = vld [vmem:[#allocation6 + $0x1a4] sm:$0xf]  ;;  %v1561_v13 = vor.u32 %v1815_v3, %v1558_v4  ;;  %911 = vmatpush.bf16.msrb.mxu0 %v1497_v10 }
  0x7b   : > { %940 = vmatpush.bf16.msrb.mxu1 %v1561_v13  ;;  %v1872_v13 = vld [vmem:[#allocation9 + $0x78] sm:$0xff] }
  0x7c   : > { %966 = vmatpush.bf16.msra.mxu2 %v1649_v15  ;;  %v1681_v15 = vor.u32 %v1845_v6, %v1678_v7  ;;  %v1857_v6 = vld [vmem:[#allocation9] sm:$0xff] }
  0x7d   : > { %995 = vmatpush.bf16.msra.mxu3 %v1713_v18  ;;  %v2436_v18 = vpack.c.bf16 %v374_v9, %v370_v8  ;;  %912 = vmatpush.bf16.msrb.mxu0 %v1489_v23 }
  0x80   : > { %967 = vmatpush.bf16.msra.mxu2 %v1641_v24  ;;  %v1550_v24 = vld [vmem:[#allocation6 + $0xa8] sm:$0xf0] }
  0x81   : > { %996 = vmatpush.bf16.msra.mxu3 %v1705_v28  ;;  %v1553_v27 = vor.u32 %v1813_v22, %v1550_v24  ;;  %v1843_v28 = vld [vmem:[#allocation6 + $0x194] sm:$0xf]  ;;  %913 = vmatpush.bf16.msrb.mxu0 %v1481_v36 }
  0x82   : > { %v1673_v34 = vor.u32 %v1843_v28, %v1670_v30  ;;  %v1871_v22 = vld [vmem:[#allocation9 + $0x70] sm:$0xff] }
  0x83   : > { %941 = vmatpush.bf16.msrb.mxu1 %v1553_v27 }
  0x84   : > { %968 = vmatpush.bf16.msra.mxu2 %v1633_v41  ;;  %v1598_v41 = vld [vmem:[#allocation6 + $0x108] sm:$0xf0] }
  0x85   : > { %997 = vmatpush.bf16.msra.mxu3 %v1697_v46  ;;  %v1601_v44 = vor.u32 %v1825_v39, %v1598_v41  ;;  %v1534_v46 = vld [vmem:[#allocation6 + $0x88] sm:$0xf0]  ;;  %914 = vmatpush.bf16.msrb.mxu0 %v1473_v48 }
  0x86   : > { %v1537_v50 = vor.u32 %v1809_v45, %v1534_v46 }
  0x87   : > { %862 = vmatmul.bf16.gmra.mxu2 %v2434_v14  ;;  %942 = vmatpush.bf16.msrb.mxu1 %v1545_v40 }
  0x88   : > { %969 = vmatpush.bf16.msra.mxu2 %v1625_v58  ;;  %891 = vmatmul.bf16.gmra.mxu3 %v2436_v18  ;;  %v401_v58 = vpack.c.bf16 %v381_v54, %v377_v53  ;;  %v1868_v54 = vld [vmem:[#allocation9 + $0x58] sm:$0xff] }
  0x89   : > { %998 = vmatpush.bf16.msra.mxu3 %v1689_v1  ;;  %915 = vmatmul.bf16.vlgmr.msrb.gmra.mxu0 %v2392_v12  ;;  %v390_v1 = vld [vmem:[%s2366_s25 + $0xf8] sm:$0xff] }
  0x8a   : > { %v406_v3 = vpack.c.bf16 %v390_v1, %v386_v0  ;;  %v1864_v12 = vld [vmem:[#allocation9 + $0x38] sm:$0xff] }
  0x8b   : > { %943 = vmatpush.bf16.msrb.mxu1 %v1537_v50  ;;  %1252 = vmatpush.bf16.msra.mxu0 %v1864_v12 }
  0x8c   : > { %970 = vmatpush.bf16.msra.mxu2 %v1617_v11 }
  0x8d   : > { %999 = vmatpush.bf16.msra.mxu3 %v1681_v15 }
  0x8e   : > { %944 = vmatmul.bf16.vlgmr.msrb.gmra.mxu1 %v2396_v17  ;;  %v1863_v17 = vld [vmem:[#allocation9 + $0x30] sm:$0xff] }
  0x8f   : > { %1253 = vmatpush.bf16.msra.mxu0 %v1863_v17  ;;  %1281 = vmatpush.bf16.msra.mxu1 %v1872_v13 }
  0x90   : > { %971 = vmatpush.bf16.msra.mxu2 %v1609_v29  ;;  %v2475_v29 = vperm.slane %v2472_v26, 0 }
  0x91   : > { %1000 = vmatpush.bf16.msra.mxu3 %v1673_v34 }
  0x93   : > { %1282 = vmatpush.bf16.msra.mxu1 %v1871_v22 }
  0x94   : > { %972 = vmatpush.bf16.msra.mxu2 %v1601_v44  ;;  %v1869_v44 = vld [vmem:[#allocation9 + $0x60] sm:$0xff] }
  0x95   : > { %1001 = vmatpush.bf16.msra.mxu3 %v1665_v52 }
  0x97   : > { %867 = vmatmul.bf16.gmra.mxu2 %v401_v58  ;;  %1283 = vmatpush.bf16.msra.mxu1 %v1870_v31 }
  0x98   : > { %896 = vmatmul.bf16.gmra.mxu3 %v402_v59 }
  0x99   : > { %920 = vmatmul.bf16.gmra.mxu0 %v2412_v51  ;;  %v1862_v51 = vld [vmem:[#allocation9 + $0x28] sm:$0xff] }
  0x9a   : > { %1254 = vmatpush.bf16.msra.mxu0 %v1862_v51 }
  0x9b   : > { %1284 = vmatpush.bf16.msra.mxu1 %v1869_v44  ;;  %v2492_v44 = vperm.slane %v2472_v26, 1 }
  0x9e   : > { %949 = vmatmul.bf16.gmra.mxu1 %v2416_v57 }
  0x9f   : > { %1285 = vmatpush.bf16.msra.mxu1 %v1868_v54 }
  0xa7   : > { %872 = vmatmul.bf16.gmra.mxu2 %v405_v2 }
  0xa8   : > { %901 = vmatmul.bf16.gmra.mxu3 %v406_v3 }
  0xa9   : > { %925 = vmatmul.bf16.gmra.mxu0 %v2384_v60  ;;  %v1861_v60 = vld [vmem:[#allocation9 + $0x20] sm:$0xff] }
  0xaa   : > { %1255 = vmatpush.bf16.msra.mxu0 %v1861_v60 }
  0xae   : > { %954 = vmatmul.bf16.gmra.mxu1 %v2386_v63 }
  0xb7   : > { %973 = vmatmul.bf16.vlgmr.msra.gmra.mxu2 %v2424_v16 }
  0xb8   : > { %1002 = vmatmul.bf16.vlgmr.msra.gmra.mxu3 %v2426_v21 }
  0xb9   : > { %930 = vmatmul.bf16.gmra.mxu0 %v2404_v32  ;;  %v1860_v32 = vld [vmem:[#allocation9 + $0x18] sm:$0xff] }
  0xba   : > { %1256 = vmatpush.bf16.msra.mxu0 %v1860_v32 }
  0xbe   : > { %959 = vmatmul.bf16.gmra.mxu1 %v2406_v35  ;;  %v1859_v35 = vld [vmem:[#allocation9 + $0x10] sm:$0xff] }
  0xbf   : > { %1257 = vmatpush.bf16.msra.mxu0 %v1859_v35 }
  0xc3   : > { %1258 = vmatpush.bf16.msra.mxu0 %v1858_v5 }
  0xc7   : > { %978 = vmatmul.bf16.gmra.mxu2 %v2434_v14  ;;  %1259 = vmatpush.bf16.msra.mxu0 %v1857_v6 }
  0xc8   : > { %1007 = vmatmul.bf16.gmra.mxu3 %v2436_v18 }
  0xd4   : > { %v800_v10 = vpop.f32.mrf.mxu0 }
  0xd6   : > { %v829_v11 = vpop.f32.mrf.mxu1 }
  0xd7   : > { %983 = vmatmul.bf16.gmra.mxu2 %v401_v58  ;;  %v830_v20 = vadd.f32 %v829_v11, %v800_v10 }
  0xd8   : > { %1012 = vmatmul.bf16.gmra.mxu3 %v402_v59 }
  0xda   : > { %v810_v63 = vpop.f32.mrf.mxu2 }
  0xdb   : > { %v839_v57 = vpop.f32.mrf.mxu3 }
  0xdc   : > { %v2460_v16 = vadd.f32 %v839_v57, %v810_v63  ;;  %v802_v18 = vpop.f32.mrf.mxu0  ;;  %v1866_v57 = vld [vmem:[#allocation9 + $0x48] sm:$0xff] }
  0xde   : > { %v831_v19 = vpop.f32.mrf.mxu1 }
  0xdf   : > { %v832_v27 = vadd.f32 %v831_v19, %v802_v18 }
  0xe2   : > { %v2462_v21 = vpop.f32.mrf.mxu2 }
  0xe3   : > { %v2464_v4 = vpop.f32.mrf.mxu3 }
  0xe4   : > { %v805_v30 = vpop.f32.mrf.mxu0  ;;  %v842_v60 = vadd.f32 %v2464_v4, %v2462_v21 }
  0xe6   : > { %v834_v34 = vpop.f32.mrf.mxu1 }
  0xe7   : > { %988 = vmatmul.bf16.gmra.mxu2 %v405_v2  ;;  %v835_v43 = vadd.f32 %v834_v34, %v805_v30  ;;  %v1867_v2 = vld [vmem:[#allocation9 + $0x50] sm:$0xff] }
  0xe8   : > { %1017 = vmatmul.bf16.gmra.mxu3 %v406_v3  ;;  %1286 = vmatpush.bf16.msra.mxu1 %v1867_v2 }
  0xea   : > { %v815_v7 = vpop.f32.mrf.mxu2 }
  0xeb   : > { %v844_v8 = vpop.f32.mrf.mxu3 }
  0xec   : > { %v2466_v9 = vadd.f32 %v844_v8, %v815_v7  ;;  %v807_v48 = vpop.f32.mrf.mxu0  ;;  %1287 = vmatpush.bf16.msra.mxu1 %v1866_v57 }
  0xee   : > { %v836_v49 = vpop.f32.mrf.mxu1 }
  0xef   : > { %v837_v52 = vadd.f32 %v836_v49, %v807_v48 }
  0xf2   : > { %v2468_v14 = vpop.f32.mrf.mxu2 }
  0xf3   : > { %v2470_v15 = vpop.f32.mrf.mxu3 }
  0xf4   : > { %v847_v4 = vadd.f32 %v2470_v15, %v2468_v14 }
  0xfa   : > { %v858_v23 = vpop.f32.mrf.mxu2 }
  0xfb   : > { %v887_v24 = vpop.f32.mrf.mxu3  ;;  %v859_v25 = vadd.f32 %v858_v23, %v830_v20 }
  0xfd   : > { %v888_v28 = vadd.f32 %v887_v24, %v859_v25 }
  0xff   : > { %v1080_v38 = vadd.f32 %v2475_v29, %v888_v28 }
 0x101   : > { %v1096_v41 = vmax.f32 %v1080_v38, 0.0 }
 0x102   : > { %v860_v33 = vpop.f32.mrf.mxu2 }
 0x103   : > { %v861_v36 = vadd.f32 %v860_v33, %v832_v27  ;;  %v889_v37 = vpop.f32.mrf.mxu3 }
 0x105   : > { %v890_v39 = vadd.f32 %v889_v37, %v861_v36 }
 0x106   : > { %v916_v10 = vpop.f32.mrf.mxu0 }
 0x107   : > { %v1082_v40 = vadd.f32 %v2475_v29, %v890_v39 }
 0x109   : > { %v1098_v42 = vmax.f32 %v1082_v40, 0.0 }
 0x10a   : > { %v863_v45 = vpop.f32.mrf.mxu2 }
 0x10b   : > { %v1112_v46 = vpack.c.bf16 %v1098_v42, %v1096_v41  ;;  %v892_v47 = vpop.f32.mrf.mxu3  ;;  %v864_v50 = vadd.f32 %v863_v45, %v835_v43  ;;  %v945_v11 = vpop.f32.mrf.mxu1 }
 0x10c   : > { %v946_v37 = vadd.f32 %v945_v11, %v916_v10 }
 0x10d   : > { %1260 = vmatmul.bf16.vlgmr.msra.gmra.mxu0 %v1112_v46  ;;  %v893_v53 = vadd.f32 %v892_v47, %v864_v50 }
 0x10e   : > { %v918_v24 = vpop.f32.mrf.mxu0 }
 0x10f   : > { %v1084_v59 = vadd.f32 %v2475_v29, %v893_v53 }
 0x111   : > { %v1100_v0 = vmax.f32 %v1084_v59, 0.0 }
 0x112   : > { %v865_v55 = vpop.f32.mrf.mxu2 }
 0x113   : > { %v866_v56 = vadd.f32 %v865_v55, %v837_v52  ;;  %v894_v58 = vpop.f32.mrf.mxu3  ;;  %v947_v27 = vpop.f32.mrf.mxu1 }
 0x114   : > { %v948_v15 = vadd.f32 %v947_v27, %v918_v24 }
 0x115   : > { %v895_v61 = vadd.f32 %v894_v58, %v866_v56 }
 0x116   : > { %v921_v41 = vpop.f32.mrf.mxu0 }
 0x117   : > { %v1086_v62 = vadd.f32 %v2475_v29, %v895_v61 }
 0x119   : > { %v1102_v1 = vmax.f32 %v1086_v62, 0.0 }
 0x11a   : > { %v868_v3 = vpop.f32.mrf.mxu2 }
 0x11b   : > { %v897_v12 = vpop.f32.mrf.mxu3  ;;  %v1114_v17 = vpack.c.bf16 %v1102_v1, %v1100_v0  ;;  %v869_v51 = vadd.f32 %v868_v3, %v2460_v16  ;;  %v1865_v16 = vld [vmem:[#allocation9 + $0x40] sm:$0xff]  ;;  %v950_v42 = vpop.f32.mrf.mxu1 }
 0x11c   : > { %1288 = vmatpush.bf16.msra.mxu1 %v1865_v16  ;;  %v951_v54 = vadd.f32 %v950_v42, %v921_v41 }
 0x11d   : > { %1265 = vmatmul.bf16.gmra.mxu0 %v1114_v17  ;;  %v898_v63 = vadd.f32 %v897_v12, %v869_v51 }
 0x11e   : > { %v923_v49 = vpop.f32.mrf.mxu0 }
 0x11f   : > { %v1088_v6 = vadd.f32 %v2475_v29, %v898_v63 }
 0x121   : > { %v1104_v13 = vmax.f32 %v1088_v6, 0.0 }
 0x122   : > { %v870_v32 = vpop.f32.mrf.mxu2 }
 0x123   : > { %v871_v35 = vadd.f32 %v870_v32, %v842_v60  ;;  %v899_v5 = vpop.f32.mrf.mxu3  ;;  %v952_v50 = vpop.f32.mrf.mxu1 }
 0x124   : > { %v953_v0 = vadd.f32 %v952_v50, %v923_v49 }
 0x125   : > { %v900_v7 = vadd.f32 %v899_v5, %v871_v35 }
 0x126   : > { %v926_v26 = vpop.f32.mrf.mxu0 }
 0x127   : > { %v1090_v8 = vadd.f32 %v2475_v29, %v900_v7 }
 0x129   : > { %v1106_v18 = vmax.f32 %v1090_v8, 0.0 }
 0x12a   : > { %v873_v19 = vpop.f32.mrf.mxu2 }
 0x12b   : > { %v902_v20 = vpop.f32.mrf.mxu3  ;;  %v1116_v22 = vpack.c.bf16 %v1106_v18, %v1104_v13  ;;  %v874_v21 = vadd.f32 %v873_v19, %v2466_v9  ;;  %v955_v62 = vpop.f32.mrf.mxu1 }
 0x12c   : > { %v956_v57 = vadd.f32 %v955_v62, %v926_v26 }
 0x12d   : > { %1270 = vmatmul.bf16.gmra.mxu0 %v1116_v22  ;;  %v903_v23 = vadd.f32 %v902_v20, %v874_v21 }
 0x12e   : > { %v928_v35 = vpop.f32.mrf.mxu0 }
 0x12f   : > { %v1092_v31 = vadd.f32 %v2475_v29, %v903_v23 }
 0x131   : > { %v1108_v36 = vmax.f32 %v1092_v31, 0.0 }
 0x132   : > { %v875_v25 = vpop.f32.mrf.mxu2 }
 0x133   : > { %v876_v28 = vadd.f32 %v875_v25, %v847_v4  ;;  %v904_v30 = vpop.f32.mrf.mxu3  ;;  %v957_v5 = vpop.f32.mrf.mxu1 }
 0x134   : > { %v958_v11 = vadd.f32 %v957_v5, %v928_v35 }
 0x135   : > { %v905_v33 = vadd.f32 %v904_v30, %v876_v28 }
 0x136   : > { %v931_v20 = vpop.f32.mrf.mxu0 }
 0x137   : > { %v1094_v34 = vadd.f32 %v2475_v29, %v905_v33 }
 0x139   : > { %v1110_v38 = vmax.f32 %v1094_v34, 0.0 }
 0x13a   : > { %v974_v39 = vpop.f32.mrf.mxu2 }
 0x13b   : > { %v1003_v9 = vpop.f32.mrf.mxu3  ;;  %v1118_v40 = vpack.c.bf16 %v1110_v38, %v1108_v36  ;;  %v975_v14 = vadd.f32 %v974_v39, %v946_v37  ;;  %v960_v22 = vpop.f32.mrf.mxu1 }
 0x13c   : > { %v961_v25 = vadd.f32 %v960_v22, %v931_v20 }
 0x13d   : > { %1275 = vmatmul.bf16.gmra.mxu0 %v1118_v40  ;;  %v1004_v43 = vadd.f32 %v1003_v9, %v975_v14 }
 0x13e   : > { %v933_v34 = vpop.f32.mrf.mxu0 }
 0x13f   : > { %v1081_v29 = vadd.f32 %v2492_v44, %v1004_v43 }
 0x141   : > { %v1097_v53 = vmax.f32 %v1081_v29, 0.0  ;;  %v1991_v29 = vld [vmem:[%s2559_s4] ss:$0 sm:$0xff] }
 0x142   : > { %v976_v45 = vpop.f32.mrf.mxu2 }
 0x143   : > { %v977_v46 = vadd.f32 %v976_v45, %v948_v15  ;;  %v1005_v47 = vpop.f32.mrf.mxu3  ;;  %v962_v36 = vpop.f32.mrf.mxu1 }
 0x144   : > { %v963_v37 = vadd.f32 %v962_v36, %v933_v34 }
 0x145   : > { %v1006_v48 = vadd.f32 %v1005_v47, %v977_v46 }
 0x147   : > { %v1083_v52 = vadd.f32 %v2492_v44, %v1006_v48 }
 0x149   : > { %v1099_v55 = vmax.f32 %v1083_v52, 0.0 }
 0x14a   : > { %v979_v56 = vpop.f32.mrf.mxu2 }
 0x14b   : > { %v1113_v58 = vpack.c.bf16 %v1099_v55, %v1097_v53  ;;  %v1008_v59 = vpop.f32.mrf.mxu3  ;;  %v980_v61 = vadd.f32 %v979_v56, %v951_v54 }
 0x14d   : > { %1289 = vmatmul.bf16.vlgmr.msra.gmra.mxu1 %v1113_v58  ;;  %v1009_v1 = vadd.f32 %v1008_v59, %v980_v61 }
 0x14f   : > { %v1085_v17 = vadd.f32 %v2492_v44, %v1009_v1 }
 0x151   : > { %v1101_v63 = vmax.f32 %v1085_v17, 0.0 }
 0x152   : > { %v981_v2 = vpop.f32.mrf.mxu2 }
 0x153   : > { %v982_v3 = vadd.f32 %v981_v2, %v953_v0  ;;  %v1010_v12 = vpop.f32.mrf.mxu3 }
 0x155   : > { %v1011_v51 = vadd.f32 %v1010_v12, %v982_v3 }
 0x157   : > { %v1087_v60 = vadd.f32 %v2492_v44, %v1011_v51 }
 0x159   : > { %v1103_v32 = vmax.f32 %v1087_v60, 0.0 }
 0x15a   : > { %v984_v6 = vpop.f32.mrf.mxu2 }
 0x15b   : > { %v1013_v7 = vpop.f32.mrf.mxu3  ;;  %v1115_v8 = vpack.c.bf16 %v1103_v32, %v1101_v63  ;;  %v985_v10 = vadd.f32 %v984_v6, %v956_v57 }
 0x15d   : > { %1294 = vmatmul.bf16.gmra.mxu1 %v1115_v8  ;;  %v1014_v13 = vadd.f32 %v1013_v7, %v985_v10 }
 0x15f   : > { %v1089_v21 = vadd.f32 %v2492_v44, %v1014_v13 }
 0x161   : > { %v1105_v24 = vmax.f32 %v1089_v21, 0.0 }
 0x162   : > { %v986_v18 = vpop.f32.mrf.mxu2 }
 0x163   : > { %v987_v16 = vadd.f32 %v986_v18, %v958_v11  ;;  %v1015_v19 = vpop.f32.mrf.mxu3 }
 0x165   : > { %v1016_v4 = vadd.f32 %v1015_v19, %v987_v16 }
 0x167   : > { %v1091_v23 = vadd.f32 %v2492_v44, %v1016_v4 }
 0x169   : > { %v1107_v27 = vmax.f32 %v1091_v23, 0.0 }
 0x16a   : > { %v989_v28 = vpop.f32.mrf.mxu2 }
 0x16b   : > { %v1018_v30 = vpop.f32.mrf.mxu3  ;;  %v1117_v31 = vpack.c.bf16 %v1107_v27, %v1105_v24  ;;  %v990_v33 = vadd.f32 %v989_v28, %v961_v25 }
 0x16d   : > { %1299 = vmatmul.bf16.gmra.mxu1 %v1117_v31  ;;  %v1019_v38 = vadd.f32 %v1018_v30, %v990_v33 }
 0x16f   : > { %v1093_v41 = vadd.f32 %v2492_v44, %v1019_v38 }
 0x171   : > { %v1109_v15 = vmax.f32 %v1093_v41, 0.0 }
 0x172   : > { %v991_v39 = vpop.f32.mrf.mxu2 }
 0x173   : > { %v992_v9 = vadd.f32 %v991_v39, %v963_v37  ;;  %v1020_v40 = vpop.f32.mrf.mxu3 }
 0x175   : > { %v1021_v42 = vadd.f32 %v1020_v40, %v992_v9 }
 0x177   : > { %v1095_v14 = vadd.f32 %v2492_v44, %v1021_v42 }
 0x179   : > { %v1111_v43 = vmax.f32 %v1095_v14, 0.0 }
 0x17b   : > { %v1119_v45 = vpack.c.bf16 %v1111_v43, %v1109_v15 }
 0x17d   : > { %1304 = vmatmul.bf16.gmra.mxu1 %v1119_v45 }
 0x18a   : > { %v1261_v46 = vpop.f32.mrf.mxu0 }
 0x18b   : > { %v1262_v48 = vadd.f32 %v1991_v29, %v1261_v46 }
 0x192   : > { %v1263_v47 = vpop.f32.mrf.mxu0 }
 0x193   : > { %v1264_v44 = vadd.f32 %v1991_v29, %v1263_v47 }
 0x19a   : > { %v1266_v52 = vpop.f32.mrf.mxu0 }
 0x19b   : > { %v1267_v56 = vadd.f32 %v1991_v29, %v1266_v52 }
 0x1a2   : > { %v1268_v55 = vpop.f32.mrf.mxu0 }
 0x1a3   : > { %v1269_v26 = vadd.f32 %v1991_v29, %v1268_v55 }
 0x1aa   : > { %v1271_v61 = vpop.f32.mrf.mxu0 }
 0x1ab   : > { %v1272_v1 = vadd.f32 %v1991_v29, %v1271_v61 }
 0x1b2   : > { %v1273_v2 = vpop.f32.mrf.mxu0 }
 0x1b3   : > { %v1274_v17 = vadd.f32 %v1991_v29, %v1273_v2 }
 0x1ba   : > { %v1276_v63 = vpop.f32.mrf.mxu0 }
 0x1bb   : > { %v1277_v57 = vadd.f32 %v1991_v29, %v1276_v63 }
 0x1c2   : > { %v1278_v5 = vpop.f32.mrf.mxu0 }
 0x1c3   : > { %v1279_v6 = vadd.f32 %v1991_v29, %v1278_v5 }
 0x1ca   : > { %v1290_v49 = vpop.f32.mrf.mxu1 }
 0x1cb   : > { %v1291_v50 = vadd.f32 %v1290_v49, %v1262_v48 }
 0x1cd   : > { %1310 = vst [vmem:[%s2506_s26] sm:$0xff] %v1291_v50 }
 0x1d2   : > { %v1292_v53 = vpop.f32.mrf.mxu1 }
 0x1d3   : > { %v1293_v54 = vadd.f32 %v1292_v53, %v1264_v44 }
 0x1d5   : > { %1311 = vst [vmem:[%s2506_s26 + $0x8] sm:$0xff] %v1293_v54 }
 0x1da   : > { %v1295_v58 = vpop.f32.mrf.mxu1 }
 0x1db   : > { %v1296_v59 = vadd.f32 %v1295_v58, %v1267_v56 }
 0x1dd   : > { %1312 = vst [vmem:[%s2506_s26 + $0x10] sm:$0xff] %v1296_v59 }
 0x1e2   : > { %v1297_v62 = vpop.f32.mrf.mxu1 }
 0x1e3   : > { %v1298_v0 = vadd.f32 %v1297_v62, %v1269_v26 }
 0x1e5   : > { %1313 = vst [vmem:[%s2506_s26 + $0x18] sm:$0xff] %v1298_v0 }
 0x1ea   : > { %v1300_v3 = vpop.f32.mrf.mxu1 }
 0x1eb   : > { %v1301_v12 = vadd.f32 %v1300_v3, %v1272_v1 }
 0x1ed   : > { %1314 = vst [vmem:[%s2506_s26 + $0x20] sm:$0xff] %v1301_v12 }
 0x1f2   : > { %v1302_v51 = vpop.f32.mrf.mxu1 }
 0x1f3   : > { %v1303_v60 = vadd.f32 %v1302_v51, %v1274_v17 }
 0x1f5   : > { %1315 = vst [vmem:[%s2506_s26 + $0x28] sm:$0xff] %v1303_v60 }
 0x1fa   : > { %v1305_v32 = vpop.f32.mrf.mxu1 }
 0x1fb   : > { %v1306_v35 = vadd.f32 %v1305_v32, %v1277_v57 }
 0x1fd   : > { %1316 = vst [vmem:[%s2506_s26 + $0x30] sm:$0xff] %v1306_v35 }
 0x202   : > { %v1307_v7 = vpop.f32.mrf.mxu1 }
 0x203   : > { %v1308_v8 = vadd.f32 %v1307_v7, %v1279_v6 }
 0x205   : > { %1317 = vst [vmem:[%s2506_s26 + $0x38] sm:$0xff] %v1308_v8 }
 0x206   : > { %2139 = shalt.err (!%p2136_p0)
}
 0x207   : > { %s2213_s10 = smov 128   ;;  %s2214_s1 = smov 8  }
 0x208   : > { %1904 = dma.vmem_to_hbm [thread:$0]  (%p2334_p3), %s1332_s30, 1024, %s1334_s6, %s1319_s9, %s2213_s10, %s2213_s10, %s2214_s1  }
 0x209 PF: > { %s1348_s2 = sand.u32 1, %s2182_s18   ;;  %p1921_p5 = pnand %p1455_p11, %p2294_p6 }
 0x20a   : > { %s1349_s3 = scalar_lea.sflag [#allocation5], %s1348_s2 }
 0x20b   : > { %p1922_p7 = pneg %p1921_p5 }
 0x20d   : > { %2177 = dma.done.wait (%p1922_p7), %s1349_s3, 1024  }
 0x20e   : > { %2179 = vsyncadd (%p1922_p7), %s1349_s3, 4294966272  ;;  %s23_s23 = sadd.s32 1, %s2202_s23   ;;  %s2575_s18 = smov %s2186_s19 }
 0x20f   : > { %p20_p9 = scmp.ge.s32.totalorder %s23_s23, 4   ;;  %s2576_s19 = smov %s2190_s20 }
 0x210   : > { %s2577_s20 = smov %s2350_s27  ;;  %s2578_s21 = smov %s2198_s22 }
 0x211   : > { %s2579_s22 = smov %s2581_s15  ;;  %22 = sbr.rel (!%p20_p9) target bundleno = 12 (0xc), region = 106 }
 0x216   :  { %1355 = vsyncpa [#allocation4], 1 }
 0x217   :  { %1357 = vsyncpa [#allocation4 + $0x1], 1 }
 0x218   :  { %1358 = vsyncpa [#allocation7], 1 }
 0x219   :  { %1359 = vsyncpa [#allocation10], 1 }
 0x21a   :  { %1360 = vsyncpa [#allocation5], 1 }
 0x21b   :  { %1362 = vsyncpa [#allocation5 + $0x1], 1 }

</bundles_post_ra>
